<compile_context>
chip_gen: v5e
topology: v5e:2x2
jax: 0.10.0
libtpu: 0.0.40
codegen_flags: <defaults>
</compile_context>

<pallas_src>
import functools

import jax
import jax.numpy as jnp
from jax.experimental import pallas as pl
from jax.experimental.pallas import tpu as pltpu

_LANE = 128


def _round_up(n, m):
    return ((n + m - 1) // m) * m


def _mlp_fused_kernel(*refs, n_layers, slope):
    """refs = (x_ref, w0, b0, w1, b1, ..., o_ref). Chains all layers in-VMEM."""
    x_ref = refs[0]
    o_ref = refs[1 + 2 * n_layers]
    h = x_ref[...].astype(jnp.float32)
    for i in range(n_layers):
        w_ref = refs[1 + 2 * i]
        b_ref = refs[2 + 2 * i]
        h = jnp.dot(h, w_ref[...], preferred_element_type=jnp.float32)
        h = h + b_ref[...]  # (1, N_pad) broadcasts over rows
        if i < n_layers - 1:
            h = jnp.where(h >= 0, h, slope * h)  # LeakyReLU(0.01)
    o_ref[...] = h.astype(o_ref.dtype)


def init_encoder_params(key, n_features, hid_size, sizes, dtype=jnp.float32):
    """Deterministic init mirroring nn.Linear shapes (W stored as (in, out))."""
    params = []
    s_in = n_features
    dims = list(sizes) + [hid_size]
    for s_out in dims:
        key, kw, kb = jax.random.split(key, 3)
        bound = 1.0 / jnp.sqrt(jnp.asarray(s_in, dtype))
        w = jax.random.uniform(kw, (s_in, s_out), dtype, -bound, bound)
        b = jax.random.uniform(kb, (s_out,), dtype, -bound, bound)
        params.append((w, b))
        s_in = s_out
    return params


def prepare_encoder_params(params):
    """Zero-pad every layer's output width (and matching input width of the next
    layer) up to a 128-lane multiple. Done once, outside the kernel."""
    padded = []
    for i, (w, b) in enumerate(params):
        s_in, s_out = w.shape
        in_pad = s_in if i == 0 else _round_up(s_in, _LANE)
        out_pad = _round_up(s_out, _LANE)
        w_p = jnp.zeros((in_pad, out_pad), w.dtype).at[:s_in, :s_out].set(w)
        b_p = jnp.zeros((1, out_pad), b.dtype).at[0, :s_out].set(b)
        padded.append((w_p, b_p))
    return padded


def encoder_forward(x, padded_params, hid_size, *, slope=0.01, tile_m=256):
    """Fused MLP forward. x: (M, n_features). Returns (M, hid_size)."""
    M, K = x.shape
    n_layers = len(padded_params)
    n_out_pad = padded_params[-1][0].shape[1]

    # TILE_M: full batch if small (block == full dim is always legal),
    # otherwise a multiple-of-8 tile; cdiv grid handles the remainder.
    TILE_M = M if M <= tile_m else tile_m
    grid = (pl.cdiv(M, TILE_M),)

    in_specs = [pl.BlockSpec((TILE_M, K), lambda i: (i, 0))]
    flat_inputs = [x]
    for w_p, b_p in padded_params:
        in_specs.append(pl.BlockSpec(w_p.shape, lambda i: (0, 0)))  # VMEM-resident
        in_specs.append(pl.BlockSpec(b_p.shape, lambda i: (0, 0)))
        flat_inputs.extend([w_p, b_p])

    kernel = functools.partial(_mlp_fused_kernel, n_layers=n_layers, slope=slope)

    out_pad = pl.pallas_call(
        kernel,
        out_shape=jax.ShapeDtypeStruct((M, n_out_pad), x.dtype),
        grid=grid,
        in_specs=in_specs,
        out_specs=pl.BlockSpec((TILE_M, n_out_pad), lambda i: (i, 0)),
        compiler_params=pltpu.CompilerParams(
            dimension_semantics=("parallel",)),  # shard batch tiles across TCs (v7x)
    )(*flat_inputs)

    return out_pad[:, :hid_size]


def encoder_reference(x, params):
    n = len(params)
    out = x
    for i, (w, b) in enumerate(params):
        out = out @ w + b
        if i < n - 1:
            out = jnp.where(out >= 0, out, 0.01 * out)
    return out


if __name__ == "__main__":
    # Small, shape-consistent example: batch=8, n_features=32, sizes=[64, 48], hid_size=16.
    n_features = 32
    sizes = [64, 48]
    hid_size = 16

    key = jax.random.PRNGKey(0)
    key_x, key_x2, key_p = jax.random.split(key, 3)
    params = init_encoder_params(key_p, n_features, hid_size, sizes)
    padded_params = prepare_encoder_params(params)

    # Small batch (single grid step, block == full array).
    x_small = jax.random.normal(key_x, (8, n_features), jnp.float32)
    out_small = jax.block_until_ready(encoder_forward(x_small, padded_params, hid_size))
    ref_small = encoder_reference(x_small, params)
    assert out_small.shape == (8, hid_size)
    assert jnp.allclose(out_small, ref_small, atol=1e-5, rtol=1e-5)

    # Larger batch to exercise the batch grid (2 tiles of 256, "parallel" axis).
    x_big = jax.random.normal(key_x2, (512, n_features), jnp.float32)
    out_big = jax.block_until_ready(encoder_forward(x_big, padded_params, hid_size))
    ref_big = encoder_reference(x_big, params)
    assert out_big.shape == (512, hid_size)
    assert jnp.allclose(out_big, ref_big, atol=1e-5, rtol=1e-5)

    # TODO(synk): for v6e/v7x at large batch, cast weights/activations to bf16
    # (keep f32 accumulation) — skipped here to bit-match the f32 reference.
    print("KERNEL_OK")
</pallas_src>

<mosaic_0001>
module attributes {stable_mosaic.version = 11 : i64} {
  func.func @_mlp_fused_kernel(%arg0: i32, %arg1: memref<8x32xf32, #tpu.memory_space<vmem>>, %arg2: memref<32x128xf32, #tpu.memory_space<vmem>>, %arg3: memref<1x128xf32, #tpu.memory_space<vmem>>, %arg4: memref<128x128xf32, #tpu.memory_space<vmem>>, %arg5: memref<1x128xf32, #tpu.memory_space<vmem>>, %arg6: memref<128x128xf32, #tpu.memory_space<vmem>>, %arg7: memref<1x128xf32, #tpu.memory_space<vmem>>, %arg8: memref<8x128xf32, #tpu.memory_space<vmem>>) attributes {dimension_semantics = [#tpu.dimension_semantics<parallel>], iteration_bounds = array<i64: 1>, scalar_prefetch = 0 : i64, scratch_operands = 0 : i64, tpu.core_type = #tpu.core_type<tc>, window_params = [{transform_indices = @transform_0, window_bounds = array<i64: 8, 32>}, {pipeline_mode = #tpu.pipeline_mode<synchronous>, transform_indices = @transform_1, window_bounds = array<i64: 32, 128>}, {pipeline_mode = #tpu.pipeline_mode<synchronous>, transform_indices = @transform_2, window_bounds = array<i64: 1, 128>}, {pipeline_mode = #tpu.pipeline_mode<synchronous>, transform_indices = @transform_3, window_bounds = array<i64: 128, 128>}, {pipeline_mode = #tpu.pipeline_mode<synchronous>, transform_indices = @transform_4, window_bounds = array<i64: 1, 128>}, {pipeline_mode = #tpu.pipeline_mode<synchronous>, transform_indices = @transform_5, window_bounds = array<i64: 128, 128>}, {pipeline_mode = #tpu.pipeline_mode<synchronous>, transform_indices = @transform_6, window_bounds = array<i64: 1, 128>}, {transform_indices = @transform_7, window_bounds = array<i64: 8, 128>}]} {
    %c0 = arith.constant 0 : index
    %c0_0 = arith.constant 0 : index
    %0 = vector.load %arg1[%c0, %c0_0] : memref<8x32xf32, #tpu.memory_space<vmem>>, vector<8x32xf32>
    %c0_1 = arith.constant 0 : index
    %c0_2 = arith.constant 0 : index
    %1 = vector.load %arg2[%c0_1, %c0_2] : memref<32x128xf32, #tpu.memory_space<vmem>>, vector<32x128xf32>
    %cst = arith.constant dense<0.000000e+00> : vector<8x128xf32>
    %2 = tpu.matmul %0, %1, %cst {dimension_numbers = #tpu.dot_dimension_numbers<[1], [0], [0], [1], [0, 0, 1, 1], [], []>} : vector<8x32xf32>, vector<32x128xf32>, vector<8x128xf32> -> vector<8x128xf32>
    %c0_3 = arith.constant 0 : index
    %c0_4 = arith.constant 0 : index
    %3 = vector.load %arg3[%c0_3, %c0_4] : memref<1x128xf32, #tpu.memory_space<vmem>>, vector<1x128xf32>
    %4 = vector.broadcast %3 : vector<1x128xf32> to vector<8x128xf32>
    %5 = arith.addf %2, %4 : vector<8x128xf32>
    %cst_5 = arith.constant 0.000000e+00 : f32
    %6 = vector.broadcast %cst_5 : f32 to vector<8x128xf32>
    %7 = arith.cmpf oge, %5, %6 : vector<8x128xf32>
    %cst_6 = arith.constant 0.00999999977 : f32
    %8 = vector.broadcast %cst_6 : f32 to vector<8x128xf32>
    %9 = arith.mulf %8, %5 : vector<8x128xf32>
    %10 = arith.select %7, %5, %9 : vector<8x128xi1>, vector<8x128xf32>
    %c0_7 = arith.constant 0 : index
    %c0_8 = arith.constant 0 : index
    %11 = vector.load %arg4[%c0_7, %c0_8] : memref<128x128xf32, #tpu.memory_space<vmem>>, vector<128x128xf32>
    %cst_9 = arith.constant dense<0.000000e+00> : vector<8x128xf32>
    %12 = tpu.matmul %10, %11, %cst_9 {dimension_numbers = #tpu.dot_dimension_numbers<[1], [0], [0], [1], [0, 0, 1, 1], [], []>} : vector<8x128xf32>, vector<128x128xf32>, vector<8x128xf32> -> vector<8x128xf32>
    %c0_10 = arith.constant 0 : index
    %c0_11 = arith.constant 0 : index
    %13 = vector.load %arg5[%c0_10, %c0_11] : memref<1x128xf32, #tpu.memory_space<vmem>>, vector<1x128xf32>
    %14 = vector.broadcast %13 : vector<1x128xf32> to vector<8x128xf32>
    %15 = arith.addf %12, %14 : vector<8x128xf32>
    %cst_12 = arith.constant 0.000000e+00 : f32
    %16 = vector.broadcast %cst_12 : f32 to vector<8x128xf32>
    %17 = arith.cmpf oge, %15, %16 : vector<8x128xf32>
    %cst_13 = arith.constant 0.00999999977 : f32
    %18 = vector.broadcast %cst_13 : f32 to vector<8x128xf32>
    %19 = arith.mulf %18, %15 : vector<8x128xf32>
    %20 = arith.select %17, %15, %19 : vector<8x128xi1>, vector<8x128xf32>
    %c0_14 = arith.constant 0 : index
    %c0_15 = arith.constant 0 : index
    %21 = vector.load %arg6[%c0_14, %c0_15] : memref<128x128xf32, #tpu.memory_space<vmem>>, vector<128x128xf32>
    %cst_16 = arith.constant dense<0.000000e+00> : vector<8x128xf32>
    %22 = tpu.matmul %20, %21, %cst_16 {dimension_numbers = #tpu.dot_dimension_numbers<[1], [0], [0], [1], [0, 0, 1, 1], [], []>} : vector<8x128xf32>, vector<128x128xf32>, vector<8x128xf32> -> vector<8x128xf32>
    %c0_17 = arith.constant 0 : index
    %c0_18 = arith.constant 0 : index
    %23 = vector.load %arg7[%c0_17, %c0_18] : memref<1x128xf32, #tpu.memory_space<vmem>>, vector<1x128xf32>
    %24 = vector.broadcast %23 : vector<1x128xf32> to vector<8x128xf32>
    %25 = arith.addf %22, %24 : vector<8x128xf32>
    %c0_19 = arith.constant 0 : index
    %c0_20 = arith.constant 0 : index
    %26 = vector.load %arg8[%c0_19, %c0_20] : memref<8x128xf32, #tpu.memory_space<vmem>>, vector<8x128xf32>
    tpu.vector_store %arg8[%c0_19, %c0_20], %25 {strides = array<i32>} : memref<8x128xf32, #tpu.memory_space<vmem>>, vector<8x128xf32>,
    return
  }
  func.func @transform_0(%arg0: i32) -> (i32, i32) {
    %c0_i32 = arith.constant 0 : i32
    %c0_i32_0 = arith.constant 0 : i32
    return %arg0, %c0_i32 : i32, i32
  }
  func.func @transform_1(%arg0: i32) -> (i32, i32) {
    %c0_i32 = arith.constant 0 : i32
    %c0_i32_0 = arith.constant 0 : i32
    %c0_i32_1 = arith.constant 0 : i32
    return %c0_i32, %c0_i32_0 : i32, i32
  }
  func.func @transform_2(%arg0: i32) -> (i32, i32) {
    %c0_i32 = arith.constant 0 : i32
    %c0_i32_0 = arith.constant 0 : i32
    %c0_i32_1 = arith.constant 0 : i32
    return %c0_i32, %c0_i32_0 : i32, i32
  }
  func.func @transform_3(%arg0: i32) -> (i32, i32) {
    %c0_i32 = arith.constant 0 : i32
    %c0_i32_0 = arith.constant 0 : i32
    %c0_i32_1 = arith.constant 0 : i32
    return %c0_i32, %c0_i32_0 : i32, i32
  }
  func.func @transform_4(%arg0: i32) -> (i32, i32) {
    %c0_i32 = arith.constant 0 : i32
    %c0_i32_0 = arith.constant 0 : i32
    %c0_i32_1 = arith.constant 0 : i32
    return %c0_i32, %c0_i32_0 : i32, i32
  }
  func.func @transform_5(%arg0: i32) -> (i32, i32) {
    %c0_i32 = arith.constant 0 : i32
    %c0_i32_0 = arith.constant 0 : i32
    %c0_i32_1 = arith.constant 0 : i32
    return %c0_i32, %c0_i32_0 : i32, i32
  }
  func.func @transform_6(%arg0: i32) -> (i32, i32) {
    %c0_i32 = arith.constant 0 : i32
    %c0_i32_0 = arith.constant 0 : i32
    %c0_i32_1 = arith.constant 0 : i32
    return %c0_i32, %c0_i32_0 : i32, i32
  }
  func.func @transform_7(%arg0: i32) -> (i32, i32) {
    %c0_i32 = arith.constant 0 : i32
    %c0_i32_0 = arith.constant 0 : i32
    return %arg0, %c0_i32 : i32, i32
  }
}

</mosaic_0001>

<bundles_post_ra>
// kernel: tpu_custom_call.1
= control target key start
LH: loop header
LB: loop body
LE: loop exit
PB: predicated region body
PF: predicated region fallthrough
CT: control target
= control target key end

     0   :  { %12 = vsyncpa [#allocation3], 0  ;;  %s437_s0 = inlined_call_operand.hbm [shape: f32[8,32], index: 0, kind: input, shape index: {}]   ;;  %s438_s1 = inlined_call_operand.hbm [shape: f32[32,128], index: 1, kind: input, shape index: {}]   ;;  %s439_s2 = inlined_call_operand.vmem [shape: f32[1,128], index: 2, kind: input, shape index: {}]   ;;  %s440_s3 = inlined_call_operand.hbm [shape: f32[128,128], index: 3, kind: input, shape index: {}]   ;;  %s441_s4 = inlined_call_operand.vmem [shape: f32[1,128], index: 4, kind: input, shape index: {}]   ;;  %s442_s5 = inlined_call_operand.hbm [shape: f32[128,128], index: 5, kind: input, shape index: {}]   ;;  %s443_s6 = inlined_call_operand.vmem [shape: f32[1,128], index: 6, kind: input, shape index: {}]   ;;  %s444_s7 = inlined_call_operand.hbm [shape: f32[8,128], index: 7, kind: output, shape index: {}]  }
   0x1   :  { %13 = vsyncpa [#allocation6], 0 }
   0x2   :  { %14 = vsyncpa [#allocation9], 0  ;;  %s31_s26 = sshll.u32 %s438_s1, 4  ;;  %s32_s26 = int_to_ptr.hbm [resolvable:$true] %s31_s26 }
   0x3   :  { %15 = vsyncpa [#allocation4], 0  ;;  %s366_s27 = smov [#allocation5]   ;;  %s21_s8 = sshll.u32 %s437_s0, 4  ;;  %s22_s8 = int_to_ptr.hbm [resolvable:$true] %s21_s8 }
   0x4   :  { %s33_s28 = sshll.u32 %s366_s27, 4  ;;  %s367_s9 = smov 128   ;;  %s34_s28 = int_to_ptr.vmem [resolvable:$true] %s33_s28 }
   0x5   :  { %s368_s10 = smov 8   ;;  %s369_s11 = smov [#allocation2]  }
   0x6   :  { %39 = dma.hbm_to_vmem [thread:$0]  %s32_s26, 512, %s34_s28, [#allocation6], %s367_s9, %s367_s9, %s368_s10  }
   0x7   :  { %s23_s12 = sshll.u32 %s369_s11, 4  ;;  %s46_s15 = sshll.u32 %s440_s3, 4  ;;  %s24_s12 = int_to_ptr.vmem [resolvable:$true] %s23_s12  ;;  %s47_s15 = int_to_ptr.hbm [resolvable:$true] %s46_s15 }
   0x8   :  { %26 = dma.hbm_to_vmem [thread:$0]  %s22_s8, 128, %s24_s12, [#allocation3]  }
   0x9   :  { %s61_s17 = sshll.u32 %s442_s5, 4  ;;  %s370_s18 = smov [#allocation7]   ;;  %s62_s17 = int_to_ptr.hbm [resolvable:$true] %s61_s17 }
   0xa   :  { %s48_s19 = sshll.u32 %s370_s18, 4  ;;  %s371_s0 = smov [#allocation8]   ;;  %s49_s19 = int_to_ptr.vmem [resolvable:$true] %s48_s19 }
   0xb   :  { %54 = dma.hbm_to_vmem [thread:$0]  %s47_s15, 2048, %s49_s19, [#allocation6], %s367_s9, %s367_s9, %s368_s10  }
   0xc   :  { %s63_s20 = sshll.u32 %s371_s0, 4  ;;  %s64_s20 = int_to_ptr.vmem [resolvable:$true] %s63_s20 }
   0xd   :  { %69 = dma.hbm_to_vmem [thread:$0]  %s62_s17, 2048, %s64_s20, [#allocation9], %s367_s9, %s367_s9, %s368_s10  }
   0xe   :  { %358 = dma.done.wait [#allocation3], 128  }
   0xf   :  { %359 = vsyncadd [#allocation3], 4294967168 }
  0x10   :  { %360 = dma.done.wait [#allocation6], 2560  }
  0x11   :  { %361 = vsyncadd [#allocation6], 4294964736 }
  0x12   :  { %362 = dma.done.wait [#allocation9], 2048  }
  0x13   :  { %363 = vsyncadd [#allocation9], 4294965248  ;;  %v92_v0 = vld [vmem:[#allocation5 + $0x18] sm:$0xff]  ;;  %v91_v1 = vld [vmem:[#allocation5 + $0x10] sm:$0xff]  ;;  %vm97_vm0 = vcmask 261120   ;;  %s372_s24 = smov [#allocation10]  }
  0x14   :  { %113 = vmatpush.msra.mxu0 %v92_v0  ;;  %v139_v2 = vld [vmem:[#allocation7 + $0x78] sm:$0xff]  ;;  %v90_v3 = vld [vmem:[#allocation5 + $0x8] sm:$0xff]  ;;  %v138_v4 = vld [vmem:[#allocation7 + $0x70] sm:$0xff]  ;;  %s213_s25 = sshll.u32 %s372_s24, 4  ;;  %s215_s28 = sshll.u32 %s444_s7, 4  ;;  %s214_s25 = int_to_ptr.vmem [resolvable:$true] %s213_s25  ;;  %s216_s28 = int_to_ptr.hbm [resolvable:$true] %s215_s28 }
  0x15   :  { %144 = vmatpush.msra.mxu1 %v139_v2  ;;  %v137_v5 = vld [vmem:[#allocation7 + $0x68] sm:$0xff]  ;;  %v89_v6 = vld [vmem:[#allocation5] sm:$0xff]  ;;  %v88_v7 = vld [vmem:[#allocation2] sm:$0xff] }
  0x16   :  { %114 = vmatpush.msra.mxu0 %v91_v1  ;;  %v136_v8 = vld [vmem:[#allocation7 + $0x60] sm:$0xff]  ;;  %v135_v9 = vld [vmem:[#allocation7 + $0x58] sm:$0xff]  ;;  %v134_v10 = vld [vmem:[#allocation7 + $0x50] sm:$0xff] }
  0x17   :  { %145 = vmatpush.msra.mxu1 %v138_v4  ;;  %v133_v11 = vld [vmem:[#allocation7 + $0x48] sm:$0xff]  ;;  %v132_v12 = vld [vmem:[#allocation7 + $0x40] sm:$0xff]  ;;  %v131_v13 = vld [vmem:[#allocation7 + $0x38] sm:$0xff] }
  0x18   :  { %115 = vmatpush.msra.mxu0 %v90_v3  ;;  %v130_v14 = vld [vmem:[#allocation7 + $0x30] sm:$0xff]  ;;  %v129_v15 = vld [vmem:[#allocation7 + $0x28] sm:$0xff]  ;;  %v128_v16 = vld [vmem:[#allocation7 + $0x20] sm:$0xff] }
  0x19   :  { %146 = vmatpush.msra.mxu1 %v137_v5  ;;  %v127_v17 = vld [vmem:[#allocation7 + $0x18] sm:$0xff]  ;;  %v126_v18 = vld [vmem:[#allocation7 + $0x10] sm:$0xff]  ;;  %v125_v19 = vld [vmem:[#allocation7 + $0x8] sm:$0xff] }
  0x1a   :  { %116 = vmatpush.msra.mxu0 %v89_v6  ;;  %v124_v20 = vld [vmem:[#allocation7] sm:$0xff]  ;;  %v182_v21 = vld [vmem:[#allocation8 + $0x78] sm:$0xff]  ;;  %v181_v22 = vld [vmem:[#allocation8 + $0x70] sm:$0xff] }
  0x1b   :  { %227 = vmatmul.msk.f32.vlgmr.msra.gmra.mxu0 %vm97_vm0, %v88_v7  ;;  %147 = vmatpush.msra.mxu1 %v136_v8  ;;  %v180_v23 = vld [vmem:[#allocation8 + $0x68] sm:$0xff]  ;;  %v179_v24 = vld [vmem:[#allocation8 + $0x60] sm:$0xff]  ;;  %v178_v25 = vld [vmem:[#allocation8 + $0x58] sm:$0xff] }
  0x1c   :  { %187 = vmatpush.msra.mxu2 %v182_v21  ;;  %v177_v26 = vld [vmem:[#allocation8 + $0x50] sm:$0xff]  ;;  %v176_v27 = vld [vmem:[#allocation8 + $0x48] sm:$0xff]  ;;  %v175_v28 = vld [vmem:[#allocation8 + $0x40] sm:$0xff] }
  0x1d   :  { %148 = vmatpush.msra.mxu1 %v135_v9  ;;  %v174_v29 = vld [vmem:[#allocation8 + $0x38] sm:$0xff]  ;;  %v173_v30 = vld [vmem:[#allocation8 + $0x30] sm:$0xff]  ;;  %v172_v31 = vld [vmem:[#allocation8 + $0x28] sm:$0xff] }
  0x1e   :  { %188 = vmatpush.msra.mxu2 %v181_v22  ;;  %v171_v32 = vld [vmem:[#allocation8 + $0x20] sm:$0xff]  ;;  %v170_v33 = vld [vmem:[#allocation8 + $0x18] sm:$0xff]  ;;  %v169_v39 = vld [vmem:[#allocation8 + $0x10] sm:$0xff] }
  0x1f   :  { %149 = vmatpush.msra.mxu1 %v134_v10  ;;  %v235_v34 = vld [vmem:[%s439_s2] ss:$0 sm:$0xff]  ;;  %v168_v40 = vld [vmem:[#allocation8 + $0x8] sm:$0xff]  ;;  %v167_v41 = vld [vmem:[#allocation8] sm:$0xff] }
  0x20   :  { %189 = vmatpush.msra.mxu2 %v180_v23  ;;  %v236_v42 = vld [vmem:[%s441_s4] ss:$0 sm:$0xff] }
  0x21   :  { %150 = vmatpush.msra.mxu1 %v133_v11  ;;  %v237_v47 = vld [vmem:[%s443_s6] ss:$0 sm:$0xff] }
  0x22   :  { %190 = vmatpush.msra.mxu2 %v179_v24 }
  0x23   :  { %151 = vmatpush.msra.mxu1 %v132_v12 }
  0x24   :  { %191 = vmatpush.msra.mxu2 %v178_v25 }
  0x25   :  { %152 = vmatpush.msra.mxu1 %v131_v13 }
  0x26   :  { %192 = vmatpush.msra.mxu2 %v177_v26 }
  0x27   :  { %153 = vmatpush.msra.mxu1 %v130_v14 }
  0x28   :  { %193 = vmatpush.msra.mxu2 %v176_v27 }
  0x29   :  { %154 = vmatpush.msra.mxu1 %v129_v15 }
  0x2a   :  { %194 = vmatpush.msra.mxu2 %v175_v28 }
  0x2b   :  { %155 = vmatpush.msra.mxu1 %v128_v16 }
  0x2c   :  { %195 = vmatpush.msra.mxu2 %v174_v29 }
  0x2d   :  { %156 = vmatpush.msra.mxu1 %v127_v17 }
  0x2e   :  { %196 = vmatpush.msra.mxu2 %v173_v30 }
  0x2f   :  { %157 = vmatpush.msra.mxu1 %v126_v18 }
  0x30   :  { %197 = vmatpush.msra.mxu2 %v172_v31 }
  0x31   :  { %158 = vmatpush.msra.mxu1 %v125_v19 }
  0x32   :  { %198 = vmatpush.msra.mxu2 %v171_v32 }
  0x33   :  { %159 = vmatpush.msra.mxu1 %v124_v20 }
  0x34   :  { %199 = vmatpush.msra.mxu2 %v170_v33 }
  0x36   :  { %200 = vmatpush.msra.mxu2 %v169_v39 }
  0x38   :  { %201 = vmatpush.msra.mxu2 %v168_v40 }
  0x3a   :  { %202 = vmatpush.msra.mxu2 %v167_v41 }
  0x98   :  { %v118_v35 = vpop.f32.mrf.mxu0 }
  0x99   :  { %v119_v36 = vadd.f32 %v235_v34, %v118_v35 }
  0x9b   :  { %vm121_vm1 = vcmp.ge.f32.partialorder %v119_v36, 0.0  ;;  %v122_v37 = vmul.f32 0.01, %v119_v36 }
  0x9d   :  { %v123_v38 = vsel %vm121_vm1, %v119_v36, %v122_v37 }
  0x9e   :  { %160 = vmatmul.f32.vlgmr.msra.gmra.mxu1 %v123_v38 }
 0x11b   :  { %v161_v43 = vpop.f32.mrf.mxu1 }
 0x11c   :  { %v162_v44 = vadd.f32 %v236_v42, %v161_v43 }
 0x11e   :  { %vm164_vm2 = vcmp.ge.f32.partialorder %v162_v44, 0.0  ;;  %v165_v45 = vmul.f32 0.01, %v162_v44 }
 0x120   :  { %v166_v46 = vsel %vm164_vm2, %v162_v44, %v165_v45 }
 0x121   :  { %203 = vmatmul.f32.vlgmr.msra.gmra.mxu2 %v166_v46 }
 0x1a4   :  { %v204_v48 = vpop.f32.mrf.mxu2 }
 0x1a5   :  { %v205_v49 = vadd.f32 %v237_v47, %v204_v48 }
 0x1a7   :  { %207 = vst [vmem:[#allocation10] sm:$0xff] %v205_v49 }
 0x1a8   :  { %218 = dma.vmem_to_hbm [thread:$0]  %s214_s25, 128, %s216_s28, [#allocation4]  }
 0x1a9   :  { %364 = dma.done.wait [#allocation4], 128  }
 0x1aa   :  { %365 = vsyncadd [#allocation4], 4294967168 }
 0x1ab   :  { %223 = vsyncpa [#allocation3], 1 }
 0x1ac   :  { %224 = vsyncpa [#allocation6], 1 }
 0x1ad   :  { %225 = vsyncpa [#allocation9], 1 }
 0x1ae   :  { %226 = vsyncpa [#allocation4], 1 }

</bundles_post_ra>
